<compile_context>
chip_gen: v7x
topology: tpu7x:2x2x1
jax: 0.10.0
libtpu: 0.0.40
codegen_flags: <defaults>
</compile_context>

<pallas_src>
import functools

import jax
import jax.numpy as jnp
from jax import lax
from jax.experimental import pallas as pl
from jax.experimental.pallas import tpu as pltpu


def extended_lstm_kernel(xe_ref, wg_ref, bg_ref, whh_ref, wph_ref, wpl_ref,
                         bpost_ref, out_ref, g_scr, hall_scr):
    """One batch block, fully resident in VMEM.

    xe_ref   : (T, TB, nlN)  time-major local-window input (last N cols = x_t)
    wg_ref   : (nlN, 4H)     folded pre+input->gate weight (zero except the
                             last N rows)                      [matmul dtype]
    bg_ref   : (1, 4H)       b_pre @ w_ih + b_ih + b_hh                 [f32]
    whh_ref  : (H, 4H)       fused hidden->gate weight         [matmul dtype]
    wph_ref  : (1, H)        post head, hidden part                     [f32]
    wpl_ref  : (1, nlN)      post head, local-window part               [f32]
    bpost_ref: (1, 1)
    out_ref  : (T, TB)
    g_scr    : VMEM (T, TB, 4H) f32  packed hoisted input->gate projections
    hall_scr : VMEM (T, TB, H)  f32  all LSTM hidden states
    """
    T, TB, nlN = xe_ref.shape
    H = whh_ref.shape[0]
    f32 = jnp.float32
    mm_dt = whh_ref.dtype

    # ---- hoisted fused input->gates projection: one matmul for all timesteps
    xe2 = xe_ref[...].reshape(T * TB, nlN)
    g_scr[...] = (jnp.dot(xe2, wg_ref[...], preferred_element_type=f32)
                  + bg_ref[...]).reshape(T, TB, 4 * H)

    # ---- LSTM recurrence: one fused (TB,H)@(H,4H) matmul per step -----------
    whh = whh_ref[...]                       # hoisted out of the loop

    def step(t, carry):
        h, c = carry
        gates = g_scr[t] + jnp.dot(h.astype(mm_dt), whh,
                                   preferred_element_type=f32)
        # PyTorch gate order: i, f, g, o  (lane slices of the packed 4H axis).
        gi = jax.nn.sigmoid(gates[:, 0 * H:1 * H])
        gf = jax.nn.sigmoid(gates[:, 1 * H:2 * H])
        gg = jnp.tanh(gates[:, 2 * H:3 * H])
        go = jax.nn.sigmoid(gates[:, 3 * H:4 * H])
        c_new = gf * c + gi * gg
        h_new = go * jnp.tanh(c_new)
        # NOTE: this ref write is the side effect that carries the hidden
        # states out of the recurrence; the fori_loop return value below is
        # intentionally discarded — do not remove this store when refactoring.
        hall_scr[t] = h_new
        return h_new, c_new

    h0 = jnp.zeros((TB, H), f32)
    c0 = jnp.zeros((TB, H), f32)
    if T <= 32:                      # full unroll: scheduler overlaps timesteps
        carry = (h0, c0)
        for t in range(T):
            carry = step(t, carry)
    else:
        lax.fori_loop(0, T, step, (h0, c0), unroll=8)

    # ---- post head: VPU broadcast-mul + XLU lane reduce ----------------------
    # (no width-1 MXU matvecs, no (T*TB,1)->(T,TB) sublane->lane relayout).
    y_h = jnp.sum(hall_scr[...] * wph_ref[...], axis=-1)             # (T, TB)
    y_l = jnp.sum(xe_ref[...].astype(f32) * wpl_ref[...], axis=-1)   # (T, TB)
    out_ref[...] = y_h + y_l + bpost_ref[...]


def _round_up(a, m):
    return ((a + m - 1) // m) * m


@functools.partial(jax.jit, static_argnames=("use_bf16",))
def extended_lstm_forward(x, params, use_bf16=False):
    """x: (B, T, N) float32  ->  (B, T) float32."""
    B, T, N = x.shape
    H = params["w_hh"].shape[0]
    n_locals = (params["w_post"].shape[0] - H) // N
    nlN = n_locals * N
    # TODO(synk): fall back to a shifted-matvec local head when n_locals*N>128.
    assert nlN <= 128, "local window wider than one lane register not supported"

    mm_dt = jnp.bfloat16 if use_bf16 else jnp.float32

    # ---- batch padding & batch-block tiling ----------------------------------
    # TB sits on the sublane axis of the input block (multiple of 8 / 16 for
    # bf16); the output is emitted as (G, T, TB) so small TB stays legal, and
    # we split into >=2 grid blocks when possible (pipelining + v7x megacore).
    sub = 16 if use_bf16 else 8
    B_sub = _round_up(B, sub)
    if B_sub >= 256:
        TB = 128
    elif B_sub >= 2 * sub:
        TB = _round_up((B_sub + 1) // 2, sub)
    else:
        TB = B_sub
    B_pad = _round_up(B_sub, TB)
    G = B_pad // TB

    # ---- local sliding window materialized on the lane axis ------------------
    xf = x.astype(jnp.float32)
    ext = jnp.concatenate(
        [jnp.zeros((B, n_locals - 1, N), jnp.float32), xf], axis=1)  # (B,T+nl-1,N)
    idx = jnp.arange(T)[:, None] + jnp.arange(n_locals)[None, :]     # (T, nl)
    win = ext[:, idx, :].reshape(B, T, nlN)                          # (B, T, nlN)
    win = jnp.pad(win, ((0, B_pad - B), (0, 0), (0, 0)))
    xe = jnp.transpose(win, (1, 0, 2)).astype(mm_dt)                 # (T, B_pad, nlN)

    # ---- weight prep: fold pre_module into the gate weights, fuse gates ------
    w_gate_x = params["w_pre"] @ params["w_ih"]                      # (N, 4H)
    b_gate = (params["b_pre"] @ params["w_ih"]
              + params["b_ih"] + params["b_hh"])                     # (1, 4H)
    # Zero-extend so it acts directly on the local-window tensor (the current
    # x_t occupies the last N window columns); contraction dim is lane-padded
    # to 128 anyway so this costs no extra MXU work.
    w_gate = jnp.zeros((nlN, 4 * H), jnp.float32).at[nlN - N:, :].set(w_gate_x)
    w_gate = w_gate.astype(mm_dt)
    whh = params["w_hh"].astype(mm_dt)                               # (H, 4H)
    wph = params["w_post"][:H].reshape(1, H)                         # (1, H)
    wpl = params["w_post"][H:].reshape(1, nlN)                       # (1, nlN)
    b_post = params["b_post"].reshape(1, 1)

    # ---- VMEM limit: generous on v5e/v6e (128 MiB phys), safe on v7x (64) ----
    try:
        phys = pltpu.get_tpu_info().vmem_capacity_bytes
        vmem_limit = min((int(phys) * 3) // 4, 100 * 1024 * 1024)
    except Exception:
        vmem_limit = 48 * 1024 * 1024

    out = pl.pallas_call(
        extended_lstm_kernel,
        out_shape=jax.ShapeDtypeStruct((G, T, TB), jnp.float32),
        grid_spec=pltpu.PrefetchScalarGridSpec(
            num_scalar_prefetch=0,
            grid=(G,),
            in_specs=[
                pl.BlockSpec((T, TB, nlN), lambda g: (0, g, 0)),   # xe (time-major)
                pl.BlockSpec((nlN, 4 * H), lambda g: (0, 0)),      # folded gate W
                pl.BlockSpec((1, 4 * H), lambda g: (0, 0)),        # folded gate b
                pl.BlockSpec((H, 4 * H), lambda g: (0, 0)),        # w_hh (fused)
                pl.BlockSpec((1, H), lambda g: (0, 0)),            # w_post[:H]
                pl.BlockSpec((1, nlN), lambda g: (0, 0)),          # w_post[H:]
                pl.BlockSpec((1, 1), lambda g: (0, 0)),            # b_post
            ],
            out_specs=pl.BlockSpec((None, T, TB), lambda g: (g, 0, 0)),
            scratch_shapes=[
                pltpu.VMEM((T, TB, 4 * H), jnp.float32),           # packed gates
                pltpu.VMEM((T, TB, H), jnp.float32),               # hidden states
            ],
        ),
        compiler_params=pltpu.CompilerParams(
            dimension_semantics=("parallel",),      # megacore-shardable on v7x
            vmem_limit_bytes=vmem_limit,
        ),
    )(xe, w_gate, b_gate, whh, wph, wpl, b_post)

    # (G, T, TB) -> (B, T); strip batch padding.
    return jnp.transpose(out, (0, 2, 1)).reshape(G * TB, T)[:B]


# ---------------------------------------------------------------------------
# Pure-JAX reference (mirrors the PyTorch forward semantics) + init helpers.
# ---------------------------------------------------------------------------
def build_local_input(x, n_locals):
    """torch.cat([zeros(B, n_locals-1, N), x], dim=1) then sliding windows."""
    B, T, N = x.shape
    ext = jnp.concatenate([jnp.zeros((B, n_locals - 1, N), x.dtype), x], axis=1)
    windows = [ext[:, idx:idx + n_locals, :].reshape(B, n_locals * N)
               for idx in range(T)]
    return jnp.stack(windows, axis=1)                        # (B, T, n_locals*N)


def reference_forward(x, params, n_locals):
    B, T, N = x.shape
    H = params["w_hh"].shape[0]
    pre = x @ params["w_pre"] + params["b_pre"]              # (B, T, F)
    local = build_local_input(x, n_locals)                   # (B, T, n_locals*N)

    def step(carry, x_t):
        h, c = carry
        gates = (x_t @ params["w_ih"] + h @ params["w_hh"]
                 + params["b_ih"] + params["b_hh"])
        i_g, f_g, g_g, o_g = jnp.split(gates, 4, axis=-1)
        c_new = jax.nn.sigmoid(f_g) * c + jax.nn.sigmoid(i_g) * jnp.tanh(g_g)
        h_new = jax.nn.sigmoid(o_g) * jnp.tanh(c_new)
        return (h_new, c_new), h_new

    h0 = jnp.zeros((B, H), jnp.float32)
    c0 = jnp.zeros((B, H), jnp.float32)
    _, hs = lax.scan(step, (h0, c0), jnp.transpose(pre, (1, 0, 2)))
    h_all = jnp.transpose(hs, (1, 0, 2))                     # (B, T, H)

    post_in = jnp.concatenate([h_all, local], axis=-1)
    y = post_in @ params["w_post"] + params["b_post"]        # (B, T, 1)
    return jnp.squeeze(y, axis=-1)


def init_params(key, input_dim, feature_dim, hidden_dim, n_locals, output_dim=1):
    """Deterministic init; weights stored pre-transposed for right-multiply."""
    ks = jax.random.split(key, 10)

    def u(k, shape, bound):
        return jax.random.uniform(k, shape, jnp.float32, -bound, bound)

    b_pre_bound = 1.0 / jnp.sqrt(input_dim)
    b_lstm_bound = 1.0 / jnp.sqrt(hidden_dim)
    post_in_dim = hidden_dim + input_dim * n_locals
    b_post_bound = 1.0 / jnp.sqrt(post_in_dim)

    return {
        "w_pre":  u(ks[0], (input_dim, feature_dim), b_pre_bound),
        "b_pre":  u(ks[1], (1, feature_dim), b_pre_bound),
        "w_ih":   u(ks[2], (feature_dim, 4 * hidden_dim), b_lstm_bound),
        "b_ih":   u(ks[3], (1, 4 * hidden_dim), b_lstm_bound),
        "w_hh":   u(ks[4], (hidden_dim, 4 * hidden_dim), b_lstm_bound),
        "b_hh":   u(ks[5], (1, 4 * hidden_dim), b_lstm_bound),
        "w_post": u(ks[6], (post_in_dim, output_dim), b_post_bound),
        "b_post": u(ks[7], (1, output_dim), b_post_bound),
    }


if __name__ == "__main__":
    B, T = 2, 8
    input_dim = 4
    feature_dim = 8
    hidden_dim = 32
    n_locals = 3

    key = jax.random.PRNGKey(0)
    k_param, k_x = jax.random.split(key)
    params = init_params(k_param, input_dim, feature_dim, hidden_dim, n_locals)
    x = jax.random.normal(k_x, (B, T, input_dim), jnp.float32)

    ref = jax.block_until_ready(reference_forward(x, params, n_locals))

    # f32 MXU path: numerically tight vs. the reference (only fp reassociation
    # from folding w_pre into w_ih).
    out = jax.block_until_ready(extended_lstm_forward(x, params, use_bf16=False))
    assert out.shape == (B, T), out.shape
    err = float(jnp.max(jnp.abs(out - ref)))
    assert jnp.allclose(out, ref, atol=1e-4, rtol=1e-4), f"f32 max abs err = {err}"

    # bf16 MXU-operand path (v6e/v7x fast path): f32 accumulation + f32 carry,
    # so only operand-rounding error — checked with a loose tolerance.
    out_bf = jax.block_until_ready(extended_lstm_forward(x, params, use_bf16=True))
    assert out_bf.shape == (B, T), out_bf.shape
    assert bool(jnp.all(jnp.isfinite(out_bf)))
    err_bf = float(jnp.max(jnp.abs(out_bf - ref)))
    assert err_bf < 1e-1, f"bf16 max abs err = {err_bf}"

    print("KERNEL_OK")
</pallas_src>

<mosaic_0001>
module attributes {stable_mosaic.version = 11 : i64} {
  func.func @extended_lstm_kernel(%arg0: i32, %arg1: memref<8x8x12xf32, #tpu.memory_space<vmem>>, %arg2: memref<12x128xf32, #tpu.memory_space<vmem>>, %arg3: memref<1x128xf32, #tpu.memory_space<vmem>>, %arg4: memref<32x128xf32, #tpu.memory_space<vmem>>, %arg5: memref<1x32xf32, #tpu.memory_space<vmem>>, %arg6: memref<1x12xf32, #tpu.memory_space<vmem>>, %arg7: memref<1x1xf32, #tpu.memory_space<vmem>>, %arg8: memref<1x8x8xf32, #tpu.memory_space<vmem>>, %arg9: memref<8x8x128xf32, #tpu.memory_space<vmem>>, %arg10: memref<8x8x32xf32, #tpu.memory_space<vmem>>) attributes {dimension_semantics = [#tpu.dimension_semantics<parallel>], iteration_bounds = array<i64: 1>, scalar_prefetch = 0 : i64, scratch_operands = 2 : i64, tpu.core_type = #tpu.core_type<tc>, window_params = [{transform_indices = @transform_0, window_bounds = array<i64: 8, 8, 12>}, {pipeline_mode = #tpu.pipeline_mode<synchronous>, transform_indices = @transform_1, window_bounds = array<i64: 12, 128>}, {pipeline_mode = #tpu.pipeline_mode<synchronous>, transform_indices = @transform_2, window_bounds = array<i64: 1, 128>}, {pipeline_mode = #tpu.pipeline_mode<synchronous>, transform_indices = @transform_3, window_bounds = array<i64: 32, 128>}, {pipeline_mode = #tpu.pipeline_mode<synchronous>, transform_indices = @transform_4, window_bounds = array<i64: 1, 32>}, {pipeline_mode = #tpu.pipeline_mode<synchronous>, transform_indices = @transform_5, window_bounds = array<i64: 1, 12>}, {pipeline_mode = #tpu.pipeline_mode<synchronous>, transform_indices = @transform_6, window_bounds = array<i64: 1, 1>}, {transform_indices = @transform_7, window_bounds = array<i64: 1, 8, 8>}]} {
    %c0 = arith.constant 0 : index
    %c0_0 = arith.constant 0 : index
    %c0_1 = arith.constant 0 : index
    %0 = vector.load %arg1[%c0, %c0_0, %c0_1] : memref<8x8x12xf32, #tpu.memory_space<vmem>>, vector<8x8x12xf32>
    %1 = vector.shape_cast %0 : vector<8x8x12xf32> to vector<64x12xf32>
    %c0_2 = arith.constant 0 : index
    %c0_3 = arith.constant 0 : index
    %2 = vector.load %arg2[%c0_2, %c0_3] : memref<12x128xf32, #tpu.memory_space<vmem>>, vector<12x128xf32>
    %cst = arith.constant dense<0.000000e+00> : vector<64x128xf32>
    %3 = tpu.matmul %1, %2, %cst {dimension_numbers = #tpu.dot_dimension_numbers<[1], [0], [0], [1], [0, 0, 1, 1], [], []>} : vector<64x12xf32>, vector<12x128xf32>, vector<64x128xf32> -> vector<64x128xf32>
    %c0_4 = arith.constant 0 : index
    %c0_5 = arith.constant 0 : index
    %4 = vector.load %arg3[%c0_4, %c0_5] : memref<1x128xf32, #tpu.memory_space<vmem>>, vector<1x128xf32>
    %5 = vector.broadcast %4 : vector<1x128xf32> to vector<64x128xf32>
    %6 = arith.addf %3, %5 : vector<64x128xf32>
    %7 = vector.shape_cast %6 : vector<64x128xf32> to vector<8x8x128xf32>
    %c0_6 = arith.constant 0 : index
    %c0_7 = arith.constant 0 : index
    %c0_8 = arith.constant 0 : index
    %8 = vector.load %arg9[%c0_6, %c0_7, %c0_8] : memref<8x8x128xf32, #tpu.memory_space<vmem>>, vector<8x8x128xf32>
    tpu.vector_store %arg9[%c0_6, %c0_7, %c0_8], %7 {strides = array<i32>} : memref<8x8x128xf32, #tpu.memory_space<vmem>>, vector<8x8x128xf32>,
    %c0_9 = arith.constant 0 : index
    %c0_10 = arith.constant 0 : index
    %9 = vector.load %arg4[%c0_9, %c0_10] : memref<32x128xf32, #tpu.memory_space<vmem>>, vector<32x128xf32>
    %cst_11 = arith.constant 0.000000e+00 : f32
    %10 = vector.broadcast %cst_11 : f32 to vector<8x32xf32>
    %cst_12 = arith.constant 0.000000e+00 : f32
    %11 = vector.broadcast %cst_12 : f32 to vector<8x32xf32>
    %c0_13 = arith.constant 0 : index
    %c0_14 = arith.constant 0 : index
    %c0_15 = arith.constant 0 : index
    %12 = vector.load %arg9[%c0_13, %c0_14, %c0_15] : memref<8x8x128xf32, #tpu.memory_space<vmem>>, vector<1x8x128xf32>
    %13 = vector.shape_cast %12 : vector<1x8x128xf32> to vector<8x128xf32>
    %cst_16 = arith.constant dense<0.000000e+00> : vector<8x128xf32>
    %14 = tpu.matmul %10, %9, %cst_16 {dimension_numbers = #tpu.dot_dimension_numbers<[1], [0], [0], [1], [0, 0, 1, 1], [], []>} : vector<8x32xf32>, vector<32x128xf32>, vector<8x128xf32> -> vector<8x128xf32>
    %15 = arith.addf %13, %14 : vector<8x128xf32>
    %16 = vector.extract_strided_slice %15 {offsets = [0, 0], sizes = [8, 32], strides = [1, 1]} : vector<8x128xf32> to vector<8x32xf32>
    %17 = arith.negf %16 : vector<8x32xf32>
    %18 = math.exp %17 : vector<8x32xf32>
    %cst_17 = arith.constant 1.000000e+00 : f32
    %19 = vector.broadcast %cst_17 : f32 to vector<8x32xf32>
    %20 = arith.addf %19, %18 : vector<8x32xf32>
    %21 = arith.divf %19, %20 : vector<8x32xf32>
    %22 = vector.extract_strided_slice %15 {offsets = [0, 32], sizes = [8, 32], strides = [1, 1]} : vector<8x128xf32> to vector<8x32xf32>
    %23 = arith.negf %22 : vector<8x32xf32>
    %24 = math.exp %23 : vector<8x32xf32>
    %cst_18 = arith.constant 1.000000e+00 : f32
    %25 = vector.broadcast %cst_18 : f32 to vector<8x32xf32>
    %26 = arith.addf %25, %24 : vector<8x32xf32>
    %27 = arith.divf %25, %26 : vector<8x32xf32>
    %28 = vector.extract_strided_slice %15 {offsets = [0, 64], sizes = [8, 32], strides = [1, 1]} : vector<8x128xf32> to vector<8x32xf32>
    %29 = math.tanh %28 : vector<8x32xf32>
    %30 = vector.extract_strided_slice %15 {offsets = [0, 96], sizes = [8, 32], strides = [1, 1]} : vector<8x128xf32> to vector<8x32xf32>
    %31 = arith.negf %30 : vector<8x32xf32>
    %32 = math.exp %31 : vector<8x32xf32>
    %cst_19 = arith.constant 1.000000e+00 : f32
    %33 = vector.broadcast %cst_19 : f32 to vector<8x32xf32>
    %34 = arith.addf %33, %32 : vector<8x32xf32>
    %35 = arith.divf %33, %34 : vector<8x32xf32>
    %36 = arith.mulf %27, %11 : vector<8x32xf32>
    %37 = arith.mulf %21, %29 : vector<8x32xf32>
    %38 = arith.addf %36, %37 : vector<8x32xf32>
    %39 = math.tanh %38 : vector<8x32xf32>
    %40 = arith.mulf %35, %39 : vector<8x32xf32>
    %c0_20 = arith.constant 0 : index
    %c0_21 = arith.constant 0 : index
    %c0_22 = arith.constant 0 : index
    %41 = vector.load %arg10[%c0_20, %c0_21, %c0_22] : memref<8x8x32xf32, #tpu.memory_space<vmem>>, vector<1x8x32xf32>
    %42 = vector.shape_cast %41 : vector<1x8x32xf32> to vector<8x32xf32>
    %43 = vector.shape_cast %40 : vector<8x32xf32> to vector<1x8x32xf32>
    tpu.vector_store %arg10[%c0_20, %c0_21, %c0_22], %43 {strides = array<i32>} : memref<8x8x32xf32, #tpu.memory_space<vmem>>, vector<1x8x32xf32>,
    %c1 = arith.constant 1 : index
    %c0_23 = arith.constant 0 : index
    %c0_24 = arith.constant 0 : index
    %44 = vector.load %arg9[%c1, %c0_23, %c0_24] : memref<8x8x128xf32, #tpu.memory_space<vmem>>, vector<1x8x128xf32>
    %45 = vector.shape_cast %44 : vector<1x8x128xf32> to vector<8x128xf32>
    %cst_25 = arith.constant dense<0.000000e+00> : vector<8x128xf32>
    %46 = tpu.matmul %40, %9, %cst_25 {dimension_numbers = #tpu.dot_dimension_numbers<[1], [0], [0], [1], [0, 0, 1, 1], [], []>} : vector<8x32xf32>, vector<32x128xf32>, vector<8x128xf32> -> vector<8x128xf32>
    %47 = arith.addf %45, %46 : vector<8x128xf32>
    %48 = vector.extract_strided_slice %47 {offsets = [0, 0], sizes = [8, 32], strides = [1, 1]} : vector<8x128xf32> to vector<8x32xf32>
    %49 = arith.negf %48 : vector<8x32xf32>
    %50 = math.exp %49 : vector<8x32xf32>
    %cst_26 = arith.constant 1.000000e+00 : f32
    %51 = vector.broadcast %cst_26 : f32 to vector<8x32xf32>
    %52 = arith.addf %51, %50 : vector<8x32xf32>
    %53 = arith.divf %51, %52 : vector<8x32xf32>
    %54 = vector.extract_strided_slice %47 {offsets = [0, 32], sizes = [8, 32], strides = [1, 1]} : vector<8x128xf32> to vector<8x32xf32>
    %55 = arith.negf %54 : vector<8x32xf32>
    %56 = math.exp %55 : vector<8x32xf32>
    %cst_27 = arith.constant 1.000000e+00 : f32
    %57 = vector.broadcast %cst_27 : f32 to vector<8x32xf32>
    %58 = arith.addf %57, %56 : vector<8x32xf32>
    %59 = arith.divf %57, %58 : vector<8x32xf32>
    %60 = vector.extract_strided_slice %47 {offsets = [0, 64], sizes = [8, 32], strides = [1, 1]} : vector<8x128xf32> to vector<8x32xf32>
    %61 = math.tanh %60 : vector<8x32xf32>
    %62 = vector.extract_strided_slice %47 {offsets = [0, 96], sizes = [8, 32], strides = [1, 1]} : vector<8x128xf32> to vector<8x32xf32>
    %63 = arith.negf %62 : vector<8x32xf32>
    %64 = math.exp %63 : vector<8x32xf32>
    %cst_28 = arith.constant 1.000000e+00 : f32
    %65 = vector.broadcast %cst_28 : f32 to vector<8x32xf32>
    %66 = arith.addf %65, %64 : vector<8x32xf32>
    %67 = arith.divf %65, %66 : vector<8x32xf32>
    %68 = arith.mulf %59, %38 : vector<8x32xf32>
    %69 = arith.mulf %53, %61 : vector<8x32xf32>
    %70 = arith.addf %68, %69 : vector<8x32xf32>
    %71 = math.tanh %70 : vector<8x32xf32>
    %72 = arith.mulf %67, %71 : vector<8x32xf32>
    %c1_29 = arith.constant 1 : index
    %c0_30 = arith.constant 0 : index
    %c0_31 = arith.constant 0 : index
    %73 = vector.load %arg10[%c1_29, %c0_30, %c0_31] : memref<8x8x32xf32, #tpu.memory_space<vmem>>, vector<1x8x32xf32>
    %74 = vector.shape_cast %73 : vector<1x8x32xf32> to vector<8x32xf32>
    %75 = vector.shape_cast %72 : vector<8x32xf32> to vector<1x8x32xf32>
    tpu.vector_store %arg10[%c1_29, %c0_30, %c0_31], %75 {strides = array<i32>} : memref<8x8x32xf32, #tpu.memory_space<vmem>>, vector<1x8x32xf32>,
    %c2 = arith.constant 2 : index
    %c0_32 = arith.constant 0 : index
    %c0_33 = arith.constant 0 : index
    %76 = vector.load %arg9[%c2, %c0_32, %c0_33] : memref<8x8x128xf32, #tpu.memory_space<vmem>>, vector<1x8x128xf32>
    %77 = vector.shape_cast %76 : vector<1x8x128xf32> to vector<8x128xf32>
    %cst_34 = arith.constant dense<0.000000e+00> : vector<8x128xf32>
    %78 = tpu.matmul %72, %9, %cst_34 {dimension_numbers = #tpu.dot_dimension_numbers<[1], [0], [0], [1], [0, 0, 1, 1], [], []>} : vector<8x32xf32>, vector<32x128xf32>, vector<8x128xf32> -> vector<8x128xf32>
    %79 = arith.addf %77, %78 : vector<8x128xf32>
    %80 = vector.extract_strided_slice %79 {offsets = [0, 0], sizes = [8, 32], strides = [1, 1]} : vector<8x128xf32> to vector<8x32xf32>
    %81 = arith.negf %80 : vector<8x32xf32>
    %82 = math.exp %81 : vector<8x32xf32>
    %cst_35 = arith.constant 1.000000e+00 : f32
    %83 = vector.broadcast %cst_35 : f32 to vector<8x32xf32>
    %84 = arith.addf %83, %82 : vector<8x32xf32>
    %85 = arith.divf %83, %84 : vector<8x32xf32>
    %86 = vector.extract_strided_slice %79 {offsets = [0, 32], sizes = [8, 32], strides = [1, 1]} : vector<8x128xf32> to vector<8x32xf32>
    %87 = arith.negf %86 : vector<8x32xf32>
    %88 = math.exp %87 : vector<8x32xf32>
    %cst_36 = arith.constant 1.000000e+00 : f32
    %89 = vector.broadcast %cst_36 : f32 to vector<8x32xf32>
    %90 = arith.addf %89, %88 : vector<8x32xf32>
    %91 = arith.divf %89, %90 : vector<8x32xf32>
    %92 = vector.extract_strided_slice %79 {offsets = [0, 64], sizes = [8, 32], strides = [1, 1]} : vector<8x128xf32> to vector<8x32xf32>
    %93 = math.tanh %92 : vector<8x32xf32>
    %94 = vector.extract_strided_slice %79 {offsets = [0, 96], sizes = [8, 32], strides = [1, 1]} : vector<8x128xf32> to vector<8x32xf32>
    %95 = arith.negf %94 : vector<8x32xf32>
    %96 = math.exp %95 : vector<8x32xf32>
    %cst_37 = arith.constant 1.000000e+00 : f32
    %97 = vector.broadcast %cst_37 : f32 to vector<8x32xf32>
    %98 = arith.addf %97, %96 : vector<8x32xf32>
    %99 = arith.divf %97, %98 : vector<8x32xf32>
    %100 = arith.mulf %91, %70 : vector<8x32xf32>
    %101 = arith.mulf %85, %93 : vector<8x32xf32>
    %102 = arith.addf %100, %101 : vector<8x32xf32>
    %103 = math.tanh %102 : vector<8x32xf32>
    %104 = arith.mulf %99, %103 : vector<8x32xf32>
    %c2_38 = arith.constant 2 : index
    %c0_39 = arith.constant 0 : index
    %c0_40 = arith.constant 0 : index
    %105 = vector.load %arg10[%c2_38, %c0_39, %c0_40] : memref<8x8x32xf32, #tpu.memory_space<vmem>>, vector<1x8x32xf32>
    %106 = vector.shape_cast %105 : vector<1x8x32xf32> to vector<8x32xf32>
    %107 = vector.shape_cast %104 : vector<8x32xf32> to vector<1x8x32xf32>
    tpu.vector_store %arg10[%c2_38, %c0_39, %c0_40], %107 {strides = array<i32>} : memref<8x8x32xf32, #tpu.memory_space<vmem>>, vector<1x8x32xf32>,
    %c3 = arith.constant 3 : index
    %c0_41 = arith.constant 0 : index
    %c0_42 = arith.constant 0 : index
    %108 = vector.load %arg9[%c3, %c0_41, %c0_42] : memref<8x8x128xf32, #tpu.memory_space<vmem>>, vector<1x8x128xf32>
    %109 = vector.shape_cast %108 : vector<1x8x128xf32> to vector<8x128xf32>
    %cst_43 = arith.constant dense<0.000000e+00> : vector<8x128xf32>
    %110 = tpu.matmul %104, %9, %cst_43 {dimension_numbers = #tpu.dot_dimension_numbers<[1], [0], [0], [1], [0, 0, 1, 1], [], []>} : vector<8x32xf32>, vector<32x128xf32>, vector<8x128xf32> -> vector<8x128xf32>
    %111 = arith.addf %109, %110 : vector<8x128xf32>
    %112 = vector.extract_strided_slice %111 {offsets = [0, 0], sizes = [8, 32], strides = [1, 1]} : vector<8x128xf32> to vector<8x32xf32>
    %113 = arith.negf %112 : vector<8x32xf32>
    %114 = math.exp %113 : vector<8x32xf32>
    %cst_44 = arith.constant 1.000000e+00 : f32
    %115 = vector.broadcast %cst_44 : f32 to vector<8x32xf32>
    %116 = arith.addf %115, %114 : vector<8x32xf32>
    %117 = arith.divf %115, %116 : vector<8x32xf32>
    %118 = vector.extract_strided_slice %111 {offsets = [0, 32], sizes = [8, 32], strides = [1, 1]} : vector<8x128xf32> to vector<8x32xf32>
    %119 = arith.negf %118 : vector<8x32xf32>
    %120 = math.exp %119 : vector<8x32xf32>
    %cst_45 = arith.constant 1.000000e+00 : f32
    %121 = vector.broadcast %cst_45 : f32 to vector<8x32xf32>
    %122 = arith.addf %121, %120 : vector<8x32xf32>
    %123 = arith.divf %121, %122 : vector<8x32xf32>
    %124 = vector.extract_strided_slice %111 {offsets = [0, 64], sizes = [8, 32], strides = [1, 1]} : vector<8x128xf32> to vector<8x32xf32>
    %125 = math.tanh %124 : vector<8x32xf32>
    %126 = vector.extract_strided_slice %111 {offsets = [0, 96], sizes = [8, 32], strides = [1, 1]} : vector<8x128xf32> to vector<8x32xf32>
    %127 = arith.negf %126 : vector<8x32xf32>
    %128 = math.exp %127 : vector<8x32xf32>
    %cst_46 = arith.constant 1.000000e+00 : f32
    %129 = vector.broadcast %cst_46 : f32 to vector<8x32xf32>
    %130 = arith.addf %129, %128 : vector<8x32xf32>
    %131 = arith.divf %129, %130 : vector<8x32xf32>
    %132 = arith.mulf %123, %102 : vector<8x32xf32>
    %133 = arith.mulf %117, %125 : vector<8x32xf32>
    %134 = arith.addf %132, %133 : vector<8x32xf32>
    %135 = math.tanh %134 : vector<8x32xf32>
    %136 = arith.mulf %131, %135 : vector<8x32xf32>
    %c3_47 = arith.constant 3 : index
    %c0_48 = arith.constant 0 : index
    %c0_49 = arith.constant 0 : index
    %137 = vector.load %arg10[%c3_47, %c0_48, %c0_49] : memref<8x8x32xf32, #tpu.memory_space<vmem>>, vector<1x8x32xf32>
    %138 = vector.shape_cast %137 : vector<1x8x32xf32> to vector<8x32xf32>
    %139 = vector.shape_cast %136 : vector<8x32xf32> to vector<1x8x32xf32>
    tpu.vector_store %arg10[%c3_47, %c0_48, %c0_49], %139 {strides = array<i32>} : memref<8x8x32xf32, #tpu.memory_space<vmem>>, vector<1x8x32xf32>,
    %c4 = arith.constant 4 : index
    %c0_50 = arith.constant 0 : index
    %c0_51 = arith.constant 0 : index
    %140 = vector.load %arg9[%c4, %c0_50, %c0_51] : memref<8x8x128xf32, #tpu.memory_space<vmem>>, vector<1x8x128xf32>
    %141 = vector.shape_cast %140 : vector<1x8x128xf32> to vector<8x128xf32>
    %cst_52 = arith.constant dense<0.000000e+00> : vector<8x128xf32>
    %142 = tpu.matmul %136, %9, %cst_52 {dimension_numbers = #tpu.dot_dimension_numbers<[1], [0], [0], [1], [0, 0, 1, 1], [], []>} : vector<8x32xf32>, vector<32x128xf32>, vector<8x128xf32> -> vector<8x128xf32>
    %143 = arith.addf %141, %142 : vector<8x128xf32>
    %144 = vector.extract_strided_slice %143 {offsets = [0, 0], sizes = [8, 32], strides = [1, 1]} : vector<8x128xf32> to vector<8x32xf32>
    %145 = arith.negf %144 : vector<8x32xf32>
    %146 = math.exp %145 : vector<8x32xf32>
    %cst_53 = arith.constant 1.000000e+00 : f32
    %147 = vector.broadcast %cst_53 : f32 to vector<8x32xf32>
    %148 = arith.addf %147, %146 : vector<8x32xf32>
    %149 = arith.divf %147, %148 : vector<8x32xf32>
    %150 = vector.extract_strided_slice %143 {offsets = [0, 32], sizes = [8, 32], strides = [1, 1]} : vector<8x128xf32> to vector<8x32xf32>
    %151 = arith.negf %150 : vector<8x32xf32>
    %152 = math.exp %151 : vector<8x32xf32>
    %cst_54 = arith.constant 1.000000e+00 : f32
    %153 = vector.broadcast %cst_54 : f32 to vector<8x32xf32>
    %154 = arith.addf %153, %152 : vector<8x32xf32>
    %155 = arith.divf %153, %154 : vector<8x32xf32>
    %156 = vector.extract_strided_slice %143 {offsets = [0, 64], sizes = [8, 32], strides = [1, 1]} : vector<8x128xf32> to vector<8x32xf32>
    %157 = math.tanh %156 : vector<8x32xf32>
    %158 = vector.extract_strided_slice %143 {offsets = [0, 96], sizes = [8, 32], strides = [1, 1]} : vector<8x128xf32> to vector<8x32xf32>
    %159 = arith.negf %158 : vector<8x32xf32>
    %160 = math.exp %159 : vector<8x32xf32>
    %cst_55 = arith.constant 1.000000e+00 : f32
    %161 = vector.broadcast %cst_55 : f32 to vector<8x32xf32>
    %162 = arith.addf %161, %160 : vector<8x32xf32>
    %163 = arith.divf %161, %162 : vector<8x32xf32>
    %164 = arith.mulf %155, %134 : vector<8x32xf32>
    %165 = arith.mulf %149, %157 : vector<8x32xf32>
    %166 = arith.addf %164, %165 : vector<8x32xf32>
    %167 = math.tanh %166 : vector<8x32xf32>
    %168 = arith.mulf %163, %167 : vector<8x32xf32>
    %c4_56 = arith.constant 4 : index
    %c0_57 = arith.constant 0 : index
    %c0_58 = arith.constant 0 : index
    %169 = vector.load %arg10[%c4_56, %c0_57, %c0_58] : memref<8x8x32xf32, #tpu.memory_space<vmem>>, vector<1x8x32xf32>
    %170 = vector.shape_cast %169 : vector<1x8x32xf32> to vector<8x32xf32>
    %171 = vector.shape_cast %168 : vector<8x32xf32> to vector<1x8x32xf32>
    tpu.vector_store %arg10[%c4_56, %c0_57, %c0_58], %171 {strides = array<i32>} : memref<8x8x32xf32, #tpu.memory_space<vmem>>, vector<1x8x32xf32>,
    %c5 = arith.constant 5 : index
    %c0_59 = arith.constant 0 : index
    %c0_60 = arith.constant 0 : index
    %172 = vector.load %arg9[%c5, %c0_59, %c0_60] : memref<8x8x128xf32, #tpu.memory_space<vmem>>, vector<1x8x128xf32>
    %173 = vector.shape_cast %172 : vector<1x8x128xf32> to vector<8x128xf32>
    %cst_61 = arith.constant dense<0.000000e+00> : vector<8x128xf32>
    %174 = tpu.matmul %168, %9, %cst_61 {dimension_numbers = #tpu.dot_dimension_numbers<[1], [0], [0], [1], [0, 0, 1, 1], [], []>} : vector<8x32xf32>, vector<32x128xf32>, vector<8x128xf32> -> vector<8x128xf32>
    %175 = arith.addf %173, %174 : vector<8x128xf32>
    %176 = vector.extract_strided_slice %175 {offsets = [0, 0], sizes = [8, 32], strides = [1, 1]} : vector<8x128xf32> to vector<8x32xf32>
    %177 = arith.negf %176 : vector<8x32xf32>
    %178 = math.exp %177 : vector<8x32xf32>
    %cst_62 = arith.constant 1.000000e+00 : f32
    %179 = vector.broadcast %cst_62 : f32 to vector<8x32xf32>
    %180 = arith.addf %179, %178 : vector<8x32xf32>
    %181 = arith.divf %179, %180 : vector<8x32xf32>
    %182 = vector.extract_strided_slice %175 {offsets = [0, 32], sizes = [8, 32], strides = [1, 1]} : vector<8x128xf32> to vector<8x32xf32>
    %183 = arith.negf %182 : vector<8x32xf32>
    %184 = math.exp %183 : vector<8x32xf32>
    %cst_63 = arith.constant 1.000000e+00 : f32
    %185 = vector.broadcast %cst_63 : f32 to vector<8x32xf32>
    %186 = arith.addf %185, %184 : vector<8x32xf32>
    %187 = arith.divf %185, %186 : vector<8x32xf32>
    %188 = vector.extract_strided_slice %175 {offsets = [0, 64], sizes = [8, 32], strides = [1, 1]} : vector<8x128xf32> to vector<8x32xf32>
    %189 = math.tanh %188 : vector<8x32xf32>
    %190 = vector.extract_strided_slice %175 {offsets = [0, 96], sizes = [8, 32], strides = [1, 1]} : vector<8x128xf32> to vector<8x32xf32>
    %191 = arith.negf %190 : vector<8x32xf32>
    %192 = math.exp %191 : vector<8x32xf32>
    %cst_64 = arith.constant 1.000000e+00 : f32
    %193 = vector.broadcast %cst_64 : f32 to vector<8x32xf32>
    %194 = arith.addf %193, %192 : vector<8x32xf32>
    %195 = arith.divf %193, %194 : vector<8x32xf32>
    %196 = arith.mulf %187, %166 : vector<8x32xf32>
    %197 = arith.mulf %181, %189 : vector<8x32xf32>
    %198 = arith.addf %196, %197 : vector<8x32xf32>
    %199 = math.tanh %198 : vector<8x32xf32>
    %200 = arith.mulf %195, %199 : vector<8x32xf32>
    %c5_65 = arith.constant 5 : index
    %c0_66 = arith.constant 0 : index
    %c0_67 = arith.constant 0 : index
    %201 = vector.load %arg10[%c5_65, %c0_66, %c0_67] : memref<8x8x32xf32, #tpu.memory_space<vmem>>, vector<1x8x32xf32>
    %202 = vector.shape_cast %201 : vector<1x8x32xf32> to vector<8x32xf32>
    %203 = vector.shape_cast %200 : vector<8x32xf32> to vector<1x8x32xf32>
    tpu.vector_store %arg10[%c5_65, %c0_66, %c0_67], %203 {strides = array<i32>} : memref<8x8x32xf32, #tpu.memory_space<vmem>>, vector<1x8x32xf32>,
    %c6 = arith.constant 6 : index
    %c0_68 = arith.constant 0 : index
    %c0_69 = arith.constant 0 : index
    %204 = vector.load %arg9[%c6, %c0_68, %c0_69] : memref<8x8x128xf32, #tpu.memory_space<vmem>>, vector<1x8x128xf32>
    %205 = vector.shape_cast %204 : vector<1x8x128xf32> to vector<8x128xf32>
    %cst_70 = arith.constant dense<0.000000e+00> : vector<8x128xf32>
    %206 = tpu.matmul %200, %9, %cst_70 {dimension_numbers = #tpu.dot_dimension_numbers<[1], [0], [0], [1], [0, 0, 1, 1], [], []>} : vector<8x32xf32>, vector<32x128xf32>, vector<8x128xf32> -> vector<8x128xf32>
    %207 = arith.addf %205, %206 : vector<8x128xf32>
    %208 = vector.extract_strided_slice %207 {offsets = [0, 0], sizes = [8, 32], strides = [1, 1]} : vector<8x128xf32> to vector<8x32xf32>
    %209 = arith.negf %208 : vector<8x32xf32>
    %210 = math.exp %209 : vector<8x32xf32>
    %cst_71 = arith.constant 1.000000e+00 : f32
    %211 = vector.broadcast %cst_71 : f32 to vector<8x32xf32>
    %212 = arith.addf %211, %210 : vector<8x32xf32>
    %213 = arith.divf %211, %212 : vector<8x32xf32>
    %214 = vector.extract_strided_slice %207 {offsets = [0, 32], sizes = [8, 32], strides = [1, 1]} : vector<8x128xf32> to vector<8x32xf32>
    %215 = arith.negf %214 : vector<8x32xf32>
    %216 = math.exp %215 : vector<8x32xf32>
    %cst_72 = arith.constant 1.000000e+00 : f32
    %217 = vector.broadcast %cst_72 : f32 to vector<8x32xf32>
    %218 = arith.addf %217, %216 : vector<8x32xf32>
    %219 = arith.divf %217, %218 : vector<8x32xf32>
    %220 = vector.extract_strided_slice %207 {offsets = [0, 64], sizes = [8, 32], strides = [1, 1]} : vector<8x128xf32> to vector<8x32xf32>
    %221 = math.tanh %220 : vector<8x32xf32>
    %222 = vector.extract_strided_slice %207 {offsets = [0, 96], sizes = [8, 32], strides = [1, 1]} : vector<8x128xf32> to vector<8x32xf32>
    %223 = arith.negf %222 : vector<8x32xf32>
    %224 = math.exp %223 : vector<8x32xf32>
    %cst_73 = arith.constant 1.000000e+00 : f32
    %225 = vector.broadcast %cst_73 : f32 to vector<8x32xf32>
    %226 = arith.addf %225, %224 : vector<8x32xf32>
    %227 = arith.divf %225, %226 : vector<8x32xf32>
    %228 = arith.mulf %219, %198 : vector<8x32xf32>
    %229 = arith.mulf %213, %221 : vector<8x32xf32>
    %230 = arith.addf %228, %229 : vector<8x32xf32>
    %231 = math.tanh %230 : vector<8x32xf32>
    %232 = arith.mulf %227, %231 : vector<8x32xf32>
    %c6_74 = arith.constant 6 : index
    %c0_75 = arith.constant 0 : index
    %c0_76 = arith.constant 0 : index
    %233 = vector.load %arg10[%c6_74, %c0_75, %c0_76] : memref<8x8x32xf32, #tpu.memory_space<vmem>>, vector<1x8x32xf32>
    %234 = vector.shape_cast %233 : vector<1x8x32xf32> to vector<8x32xf32>
    %235 = vector.shape_cast %232 : vector<8x32xf32> to vector<1x8x32xf32>
    tpu.vector_store %arg10[%c6_74, %c0_75, %c0_76], %235 {strides = array<i32>} : memref<8x8x32xf32, #tpu.memory_space<vmem>>, vector<1x8x32xf32>,
    %c7 = arith.constant 7 : index
    %c0_77 = arith.constant 0 : index
    %c0_78 = arith.constant 0 : index
    %236 = vector.load %arg9[%c7, %c0_77, %c0_78] : memref<8x8x128xf32, #tpu.memory_space<vmem>>, vector<1x8x128xf32>
    %237 = vector.shape_cast %236 : vector<1x8x128xf32> to vector<8x128xf32>
    %cst_79 = arith.constant dense<0.000000e+00> : vector<8x128xf32>
    %238 = tpu.matmul %232, %9, %cst_79 {dimension_numbers = #tpu.dot_dimension_numbers<[1], [0], [0], [1], [0, 0, 1, 1], [], []>} : vector<8x32xf32>, vector<32x128xf32>, vector<8x128xf32> -> vector<8x128xf32>
    %239 = arith.addf %237, %238 : vector<8x128xf32>
    %240 = vector.extract_strided_slice %239 {offsets = [0, 0], sizes = [8, 32], strides = [1, 1]} : vector<8x128xf32> to vector<8x32xf32>
    %241 = arith.negf %240 : vector<8x32xf32>
    %242 = math.exp %241 : vector<8x32xf32>
    %cst_80 = arith.constant 1.000000e+00 : f32
    %243 = vector.broadcast %cst_80 : f32 to vector<8x32xf32>
    %244 = arith.addf %243, %242 : vector<8x32xf32>
    %245 = arith.divf %243, %244 : vector<8x32xf32>
    %246 = vector.extract_strided_slice %239 {offsets = [0, 32], sizes = [8, 32], strides = [1, 1]} : vector<8x128xf32> to vector<8x32xf32>
    %247 = arith.negf %246 : vector<8x32xf32>
    %248 = math.exp %247 : vector<8x32xf32>
    %cst_81 = arith.constant 1.000000e+00 : f32
    %249 = vector.broadcast %cst_81 : f32 to vector<8x32xf32>
    %250 = arith.addf %249, %248 : vector<8x32xf32>
    %251 = arith.divf %249, %250 : vector<8x32xf32>
    %252 = vector.extract_strided_slice %239 {offsets = [0, 64], sizes = [8, 32], strides = [1, 1]} : vector<8x128xf32> to vector<8x32xf32>
    %253 = math.tanh %252 : vector<8x32xf32>
    %254 = vector.extract_strided_slice %239 {offsets = [0, 96], sizes = [8, 32], strides = [1, 1]} : vector<8x128xf32> to vector<8x32xf32>
    %255 = arith.negf %254 : vector<8x32xf32>
    %256 = math.exp %255 : vector<8x32xf32>
    %cst_82 = arith.constant 1.000000e+00 : f32
    %257 = vector.broadcast %cst_82 : f32 to vector<8x32xf32>
    %258 = arith.addf %257, %256 : vector<8x32xf32>
    %259 = arith.divf %257, %258 : vector<8x32xf32>
    %260 = arith.mulf %251, %230 : vector<8x32xf32>
    %261 = arith.mulf %245, %253 : vector<8x32xf32>
    %262 = arith.addf %260, %261 : vector<8x32xf32>
    %263 = math.tanh %262 : vector<8x32xf32>
    %264 = arith.mulf %259, %263 : vector<8x32xf32>
    %c7_83 = arith.constant 7 : index
    %c0_84 = arith.constant 0 : index
    %c0_85 = arith.constant 0 : index
    %265 = vector.load %arg10[%c7_83, %c0_84, %c0_85] : memref<8x8x32xf32, #tpu.memory_space<vmem>>, vector<1x8x32xf32>
    %266 = vector.shape_cast %265 : vector<1x8x32xf32> to vector<8x32xf32>
    %267 = vector.shape_cast %264 : vector<8x32xf32> to vector<1x8x32xf32>
    tpu.vector_store %arg10[%c7_83, %c0_84, %c0_85], %267 {strides = array<i32>} : memref<8x8x32xf32, #tpu.memory_space<vmem>>, vector<1x8x32xf32>,
    %c0_86 = arith.constant 0 : index
    %c0_87 = arith.constant 0 : index
    %c0_88 = arith.constant 0 : index
    %268 = vector.load %arg10[%c0_86, %c0_87, %c0_88] : memref<8x8x32xf32, #tpu.memory_space<vmem>>, vector<8x8x32xf32>
    %c0_89 = arith.constant 0 : index
    %c0_90 = arith.constant 0 : index
    %269 = vector.load %arg5[%c0_89, %c0_90] : memref<1x32xf32, #tpu.memory_space<vmem>>, vector<1x32xf32>
    %270 = vector.shape_cast %269 : vector<1x32xf32> to vector<1x1x32xf32>
    %271 = vector.broadcast %270 : vector<1x1x32xf32> to vector<8x8x32xf32>
    %272 = arith.mulf %268, %271 : vector<8x8x32xf32>
    %cst_91 = arith.constant dense<0.000000e+00> : vector<8x8xf32>
    %273 = vector.multi_reduction <add>, %272, %cst_91 [2] : vector<8x8x32xf32> to vector<8x8xf32>
    %c0_92 = arith.constant 0 : index
    %c0_93 = arith.constant 0 : index
    %c0_94 = arith.constant 0 : index
    %274 = vector.load %arg1[%c0_92, %c0_93, %c0_94] : memref<8x8x12xf32, #tpu.memory_space<vmem>>, vector<8x8x12xf32>
    %c0_95 = arith.constant 0 : index
    %c0_96 = arith.constant 0 : index
    %275 = vector.load %arg6[%c0_95, %c0_96] : memref<1x12xf32, #tpu.memory_space<vmem>>, vector<1x12xf32>
    %276 = vector.shape_cast %275 : vector<1x12xf32> to vector<1x1x12xf32>
    %277 = vector.broadcast %276 : vector<1x1x12xf32> to vector<8x8x12xf32>
    %278 = arith.mulf %274, %277 : vector<8x8x12xf32>
    %cst_97 = arith.constant dense<0.000000e+00> : vector<8x8xf32>
    %279 = vector.multi_reduction <add>, %278, %cst_97 [2] : vector<8x8x12xf32> to vector<8x8xf32>
    %280 = arith.addf %273, %279 : vector<8x8xf32>
    %c0_98 = arith.constant 0 : index
    %c0_99 = arith.constant 0 : index
    %281 = vector.load %arg7[%c0_98, %c0_99] : memref<1x1xf32, #tpu.memory_space<vmem>>, vector<1x1xf32>
    %282 = vector.broadcast %281 : vector<1x1xf32> to vector<8x8xf32>
    %283 = arith.addf %280, %282 : vector<8x8xf32>
    %c0_100 = arith.constant 0 : index
    %c0_101 = arith.constant 0 : index
    %c0_102 = arith.constant 0 : index
    %284 = vector.load %arg8[%c0_100, %c0_101, %c0_102] : memref<1x8x8xf32, #tpu.memory_space<vmem>>, vector<1x8x8xf32>
    %285 = vector.shape_cast %284 : vector<1x8x8xf32> to vector<8x8xf32>
    %286 = vector.shape_cast %283 : vector<8x8xf32> to vector<1x8x8xf32>
    tpu.vector_store %arg8[%c0_100, %c0_101, %c0_102], %286 {strides = array<i32>} : memref<1x8x8xf32, #tpu.memory_space<vmem>>, vector<1x8x8xf32>,
    return
  }
  func.func @transform_0(%arg0: i32) -> (i32, i32, i32) {
    %c0_i32 = arith.constant 0 : i32
    %c0_i32_0 = arith.constant 0 : i32
    %c0_i32_1 = arith.constant 0 : i32
    return %c0_i32, %arg0, %c0_i32_0 : i32, i32, i32
  }
  func.func @transform_1(%arg0: i32) -> (i32, i32) {
    %c0_i32 = arith.constant 0 : i32
    %c0_i32_0 = arith.constant 0 : i32
    %c0_i32_1 = arith.constant 0 : i32
    return %c0_i32, %c0_i32_0 : i32, i32
  }
  func.func @transform_2(%arg0: i32) -> (i32, i32) {
    %c0_i32 = arith.constant 0 : i32
    %c0_i32_0 = arith.constant 0 : i32
    %c0_i32_1 = arith.constant 0 : i32
    return %c0_i32, %c0_i32_0 : i32, i32
  }
  func.func @transform_3(%arg0: i32) -> (i32, i32) {
    %c0_i32 = arith.constant 0 : i32
    %c0_i32_0 = arith.constant 0 : i32
    %c0_i32_1 = arith.constant 0 : i32
    return %c0_i32, %c0_i32_0 : i32, i32
  }
  func.func @transform_4(%arg0: i32) -> (i32, i32) {
    %c0_i32 = arith.constant 0 : i32
    %c0_i32_0 = arith.constant 0 : i32
    %c0_i32_1 = arith.constant 0 : i32
    return %c0_i32, %c0_i32_0 : i32, i32
  }
  func.func @transform_5(%arg0: i32) -> (i32, i32) {
    %c0_i32 = arith.constant 0 : i32
    %c0_i32_0 = arith.constant 0 : i32
    %c0_i32_1 = arith.constant 0 : i32
    return %c0_i32, %c0_i32_0 : i32, i32
  }
  func.func @transform_6(%arg0: i32) -> (i32, i32) {
    %c0_i32 = arith.constant 0 : i32
    %c0_i32_0 = arith.constant 0 : i32
    %c0_i32_1 = arith.constant 0 : i32
    return %c0_i32, %c0_i32_0 : i32, i32
  }
  func.func @transform_7(%arg0: i32) -> (i32, i32, i32) {
    %c0_i32 = arith.constant 0 : i32
    %c0_i32_0 = arith.constant 0 : i32
    %c0_i32_1 = arith.constant 0 : i32
    return %arg0, %c0_i32, %c0_i32_0 : i32, i32, i32
  }
}

</mosaic_0001>

<bundles_post_ra>
// kernel: extended_lstm_forward.1
= control target key start
LH: loop header
LB: loop body
LE: loop exit
PB: predicated region body
PF: predicated region fallthrough
CT: control target
= control target key end

     0   :  { %vm70_vm0 = vcmask 1043456   ;;  %vm45_vm1 = vcmask 97280   ;;  %v1523_v0 = vmov 0.0|0.0   ;;  %vm1524_vm2 = vmmov 1   ;;  %s1527_s17 = smov 64   ;;  %s1816_s1 = inlined_call_operand.vmem [shape: f32[12,128], index: 1, kind: input, shape index: {}]   ;;  %s1817_s3 = inlined_call_operand.vmem [shape: f32[32,128], index: 3, kind: input, shape index: {}]   ;;  %s1818_s0 = inlined_call_operand.vmem [shape: f32[8,8,12], index: 0, kind: input, shape index: {}]   ;;  %s1819_s2 = inlined_call_operand.vmem [shape: f32[1,128], index: 2, kind: input, shape index: {}]   ;;  %s1820_s4 = inlined_call_operand.vmem [shape: f32[1,32], index: 4, kind: input, shape index: {}]   ;;  %s1821_s5 = inlined_call_operand.vmem [shape: f32[1,12], index: 5, kind: input, shape index: {}]   ;;  %s1822_s6 = inlined_call_operand.<no memory space> [shape: f32[1,1], index: 6, kind: input, shape index: {}]   ;;  %s1823_s7 = inlined_call_operand.vmem [shape: f32[1,8,8], index: 7, kind: output, shape index: {}]  }
   0x1   :  { %1402 = vmatprep.subr.bf16.mxu1 %v1523_v0  ;;  %v36_v1 = vld [vmem:[%s1816_s1] sm:$0xff]  ;;  %v37_v2 = vld [vmem:[%s1816_s1 + $0x8] sm:$0xf]  ;;  %vm1397_vm3 = vmpackc.low %vm70_vm0, %vm1524_vm2  ;;  %vm1525_vm4 = vmmov 0   ;;  %v1526_v7 = vmov 0.0   ;;  %vm192_vm5 = vcmask 261120  }
   0x2   :  { %v1396_v3 = vpack.c.bf16 %v37_v2, %v36_v1  ;;  %v187_v4 = vld [vmem:[%s1817_s3] sm:$0xff]  ;;  %v188_v5 = vld [vmem:[%s1817_s3 + $0x8] sm:$0xff]  ;;  %1316 = vmatprep.mubr.msk.f32.mxu1 %vm1525_vm4, %v1526_v7  ;;  %v189_v9 = vld [vmem:[%s1817_s3 + $0x10] sm:$0xff]  ;;  %vm1193_vm6 = vcmask 1041409   ;;  %vm1195_vm7 = vcmask 1042434   ;;  %vm1197_vm8 = vcmask 1043459  }
   0x3   :  { %v1586_v6 = vld [vmem:[%s1818_s0] sm:$0xff]  ;;  %v1590_v8 = vpack.c.bf16 %v188_v5, %v187_v4  ;;  %v190_v10 = vld [vmem:[%s1817_s3 + $0x18] sm:$0xff]  ;;  %v1604_v11 = vld [vmem:[%s1818_s0 + $0x8] sm:$0xff]  ;;  %vm1199_vm9 = vcmask 1044484   ;;  %vm1201_vm10 = vcmask 1045509   ;;  %vm1203_vm11 = vcmask 1046534  }
   0x4   :  { %1296 = vmatprep.mubr.msk.f32.mxu0 %vm45_vm1, %v1586_v6  ;;  %1398 = vmatprep.subr.msk.bf16.mxu0 %vm1397_vm3, %v1396_v3  ;;  %v1606_v12 = vpack.c.bf16 %v190_v10, %v189_v9  ;;  %v1628_v13 = vld [vmem:[%s1819_s2] ss:$0 sm:$0xff]  ;;  %s1528_s2 = smov 32   ;;  %v1649_v48 = vld [vmem:[%s1818_s0 + $0x10] sm:$0xff]  ;;  %v1654_v49 = vld [vmem:[%s1818_s0 + $0x18] sm:$0xff]  ;;  %vm1205_vm12 = vcmask 1047559  }
   0x5   :  { %1404 = vmatpush3.bf16.msra.mxu1 %v1590_v8  ;;  %1401 = vmatpush3.bf16.msk.msra.mxu0 %vm1397_vm3, %v1396_v3  ;;  %v1659_v50 = vld [vmem:[%s1818_s0 + $0x20] sm:$0xff]  ;;  %v1670_v51 = vld [vmem:[%s1818_s0 + $0x28] sm:$0xff]  ;;  %v1675_v52 = vld [vmem:[%s1818_s0 + $0x30] sm:$0xff]  ;;  %vm1208_vm13 = vcmask 64512  }
   0x6   :  { %1405 = vmatprep.subr.bf16.mxu1 %v1523_v0  ;;  %1414 = vmatprep.subr.bf16.mxu0 %v1523_v0  ;;  %v1684_v53 = vld [vmem:[%s1818_s0 + $0x38] sm:$0xff] }
   0x8   :  { %1297 = vmatmul.mubr.msk.f32.vlgmr.msra.gmra.mrb[0].mxu0 %vm45_vm1, %v1604_v11 }
   0x9   :  { %1407 = vmatpush3.bf16.msra.mxu1 %v1606_v12  ;;  %1416 = vmatpush3.bf16.msra.mxu0 %v1590_v8 }
   0xa   :  { %1408 = vmatprep.subr.bf16.mxu1 %v1523_v0  ;;  %1417 = vmatprep.subr.bf16.mxu0 %v1523_v0 }
   0xb   :  { %1299 = vmatprep.mubr.msk.f32.mxu0 %vm45_vm1, %v1649_v48 }
   0xc   :  { %1317 = vmatmul.mubr.f32.vlgmr.msra.gmra.mrb[0].mxu1 %v1526_v7  ;;  %1300 = vmatmul.mubr.msk.f32.gmra.mrb[2].mxu0 %vm45_vm1, %v1654_v49 }
   0xd   :  { %1410 = vmatpush3.bf16.msra.mxu1 %v1590_v8  ;;  %1327 = vmatprep.mubr.msk.f32.mxu1 %vm1525_vm4, %v1526_v7 }
   0xe   :  { %1411 = vmatprep.subr.bf16.mxu1 %v1523_v0  ;;  %1419 = vmatpush3.bf16.msra.mxu0 %v1606_v12 }
   0xf   :  { %1426 = vmatprep.subr.bf16.mxu0 %v1523_v0  ;;  %1302 = vmatprep.mubr.msk.f32.mxu0 %vm45_vm1, %v1659_v50 }
  0x10   :  { %1303 = vmatmul.mubr.msk.f32.gmra.mrb[4].mxu0 %vm45_vm1, %v1670_v51 }
  0x11   :  { %1413 = vmatpush3.bf16.msra.mxu1 %v1606_v12  ;;  %1305 = vmatprep.mubr.msk.f32.mxu0 %vm45_vm1, %v1675_v52 }
  0x12   :  { %1420 = vmatprep.subr.bf16.mxu1 %v1523_v0 }
  0x14   :  { %1306 = vmatmul.mubr.msk.f32.gmra.mrb[6].mxu0 %vm45_vm1, %v1684_v53 }
  0x15   :  { %1338 = vmatprep.mubr.msk.f32.mxu0 %vm1525_vm4, %v1526_v7 }
  0xdb   :  { %v1298_v14 = vpop.f32.mrb[0].mxu0 }
  0xdc   :  { %v140_v15 = vpop.f32.mrb[1].mxu0  ;;  %v146_v34 = vadd.f32 %v1298_v14, %v1628_v13 }
  0xdd   :  { %v141_v16 = vadd.f32 %v1628_v13, %v140_v15 }
  0xdf   :  { %v262_v17 = vpop.f32.mrb[0].mxu1  ;;  %v1301_v57 = vpop.f32.mrb[2].mxu0 }
  0xe0   :  { %v266_v18 = vadd.f32 %v262_v17, %v141_v16  ;;  %v1318_v19 = vpop.f32.mrb[1].mxu1  ;;  %v150_v58 = vpop.f32.mrb[3].mxu0 }
  0xe1   :  { %v151_v1 = vadd.f32 %v1628_v13, %v150_v58 }
  0xe2   :  { %1459 = vtanh.f32 %v266_v18  ;;  %v1224_v21 = vmul.f32 -1.442695, %v266_v18 }
  0xe3   :  { %v1692_v59 = vpop.f32.mrb[4].mxu0 }
  0xe4   :  { %1461 = vpow2.f32 %v1224_v21  ;;  %v1694_v60 = vpop.f32.mrb[5].mxu0 }
  0xe7   :  { %v1696_v61 = vpop.f32.mrb[6].mxu0 }
  0xe8   :  { %v1698_v62 = vpop.f32.mrb[7].mxu0 }
  0xec   :  { %v1460_v20 = vpop.eup %1459 }
  0xed   :  { %276 = vrot.lane.b32.xlu0 %v1460_v20, %s1527_s17 }
  0xee   :  { %v1462_v22 = vpop.eup %1461 }
  0xef   :  { %v270_v23 = vadd.f32 1.0, %v1462_v22 }
  0xf1   :  { %1463 = vrcp.f32 %v270_v23 }
  0xfb   :  { %v1464_v24 = vpop.eup %1463 }
  0xfc   :  { %v274_v27 = vmul.f32 0.0, %v1464_v24 }
 0x15f   :  { %v277_v25 = vpop.permute.xlu0 %276 }
 0x160   :  { %v279_v26 = vmul.f32 %v1464_v24, %v277_v25  ;;  %v156_v25 = vadd.f32 %v1301_v57, %v1628_v13 }
 0x162   :  { %281 = vrot.lane.b32.xlu0 %v279_v26, %s1528_s2 }
 0x1d4   :  { %v282_v28 = vpop.permute.xlu0 %281 }
 0x1d5   :  { %v284_v29 = vadd.f32 %v282_v28, %v274_v27 }
 0x1d7   :  { %1465 = vtanh.f32 %v284_v29 }
 0x1e1   :  { %v1466_v30 = vpop.eup %1465 }
 0x1e2   :  { %287 = vrot.lane.b32.xlu1 %v1466_v30, %s1527_s17 }
 0x254   :  { %v288_v31 = vpop.permute.xlu1 %287 }
 0x255   :  { %v290_v32 = vmul.f32 %v1464_v24, %v288_v31 }
 0x257   :  { %292 = vrot.lane.b32.xlu1 %v290_v32, %s1528_s2 }
 0x2c9   :  { %v293_v33 = vpop.permute.xlu1 %292 }
 0x2ca   :  { %295 = vst.msk [vmem:[#allocation3] sm:$0xff] %vm192_vm5, %v293_v33  ;;  %1328 = vmatmul.mubr.msk.f32.vlgmr.msra.gmra.mrb[2].mxu1 %vm192_vm5, %v293_v33 }
 0x2cb   :  { %1422 = vmatpush3.bf16.msra.mxu1 %v1590_v8  ;;  %1349 = vmatprep.mubr.msk.f32.mxu1 %vm1525_vm4, %v1526_v7 }
 0x2cc   :  { %1423 = vmatprep.subr.bf16.mxu1 %v1523_v0 }
 0x2cf   :  { %1425 = vmatpush3.bf16.msra.mxu1 %v1606_v12 }
 0x2d0   :  { %1432 = vmatprep.subr.bf16.mxu1 %v1523_v0 }
 0x39d   :  { %v366_v35 = vpop.f32.mrb[2].mxu1 }
 0x39e   :  { %v370_v36 = vadd.f32 %v366_v35, %v146_v34  ;;  %v1329_v37 = vpop.f32.mrb[3].mxu1 }
 0x3a0   :  { %1467 = vtanh.f32 %v370_v36  ;;  %v1226_v39 = vmul.f32 -1.442695, %v370_v36 }
 0x3a2   :  { %1469 = vpow2.f32 %v1226_v39 }
 0x3aa   :  { %v1468_v38 = vpop.eup %1467 }
 0x3ab   :  { %380 = vrot.lane.b32.xlu0 %v1468_v38, %s1527_s17 }
 0x3ac   :  { %v1470_v40 = vpop.eup %1469 }
 0x3ad   :  { %v374_v41 = vadd.f32 1.0, %v1470_v40 }
 0x3af   :  { %1471 = vrcp.f32 %v374_v41 }
 0x3b9   :  { %v1472_v42 = vpop.eup %1471 }
 0x3ba   :  { %v378_v45 = vmul.f32 %v1472_v42, %v284_v29 }
 0x41d   :  { %v381_v43 = vpop.permute.xlu0 %380 }
 0x41e   :  { %v383_v44 = vmul.f32 %v1472_v42, %v381_v43  ;;  %v161_v43 = vadd.f32 %v1628_v13, %v1694_v60 }
 0x420   :  { %385 = vrot.lane.b32.xlu1 %v383_v44, %s1528_s2 }
 0x492   :  { %v386_v46 = vpop.permute.xlu1 %385 }
 0x493   :  { %v388_v47 = vadd.f32 %v386_v46, %v378_v45 }
 0x495   :  { %1473 = vtanh.f32 %v388_v47 }
 0x49f   :  { %v1474_v54 = vpop.eup %1473 }
 0x4a0   :  { %391 = vrot.lane.b32.xlu0 %v1474_v54, %s1527_s17 }
 0x512   :  { %v392_v55 = vpop.permute.xlu0 %391 }
 0x513   :  { %v394_v56 = vmul.f32 %v1472_v42, %v392_v55 }
 0x515   :  { %396 = vrot.lane.b32.xlu1 %v394_v56, %s1528_s2 }
 0x587   :  { %v397_v63 = vpop.permute.xlu1 %396 }
 0x588   :  { %400 = vst.msk [vmem:[#allocation3 + $0x8] sm:$0xff] %vm192_vm5, %v397_v63  ;;  %1339 = vmatmul.mubr.msk.f32.vlgmr.msra.gmra.mrb[8].mxu0 %vm192_vm5, %v397_v63 }
 0x589   :  { %1428 = vmatpush3.bf16.msra.mxu0 %v1590_v8  ;;  %1360 = vmatprep.mubr.msk.f32.mxu0 %vm1525_vm4, %v1526_v7 }
 0x58a   :  { %1429 = vmatprep.subr.bf16.mxu0 %v1523_v0 }
 0x58d   :  { %1431 = vmatpush3.bf16.msra.mxu0 %v1606_v12 }
 0x58e   :  { %1438 = vmatprep.subr.bf16.mxu0 %v1523_v0 }
 0x65b   :  { %v471_v2 = vpop.f32.mrb[8].mxu0 }
 0x65c   :  { %v475_v3 = vadd.f32 %v471_v2, %v151_v1  ;;  %v1340_v4 = vpop.f32.mrb[9].mxu0 }
 0x65e   :  { %1475 = vtanh.f32 %v475_v3  ;;  %v1228_v9 = vmul.f32 -1.442695, %v475_v3 }
 0x660   :  { %1477 = vpow2.f32 %v1228_v9 }
 0x668   :  { %v1476_v5 = vpop.eup %1475 }
 0x669   :  { %485 = vrot.lane.b32.xlu0 %v1476_v5, %s1527_s17 }
 0x66a   :  { %v1478_v10 = vpop.eup %1477 }
 0x66b   :  { %v479_v14 = vadd.f32 1.0, %v1478_v10  ;;  %v166_v10 = vadd.f32 %v1692_v59, %v1628_v13 }
 0x66d   :  { %1479 = vrcp.f32 %v479_v14 }
 0x677   :  { %v1480_v15 = vpop.eup %1479 }
 0x678   :  { %v483_v18 = vmul.f32 %v1480_v15, %v388_v47 }
 0x6db   :  { %v486_v16 = vpop.permute.xlu0 %485 }
 0x6dc   :  { %v488_v17 = vmul.f32 %v1480_v15, %v486_v16 }
 0x6de   :  { %490 = vrot.lane.b32.xlu1 %v488_v17, %s1528_s2 }
 0x750   :  { %v491_v19 = vpop.permute.xlu1 %490 }
 0x751   :  { %v493_v20 = vadd.f32 %v491_v19, %v483_v18 }
 0x753   :  { %1481 = vtanh.f32 %v493_v20 }
 0x75d   :  { %v1482_v21 = vpop.eup %1481 }
 0x75e   :  { %496 = vrot.lane.b32.xlu0 %v1482_v21, %s1527_s17 }
 0x7d0   :  { %v497_v22 = vpop.permute.xlu0 %496 }
 0x7d1   :  { %v499_v23 = vmul.f32 %v1480_v15, %v497_v22 }
 0x7d3   :  { %501 = vrot.lane.b32.xlu1 %v499_v23, %s1528_s2 }
 0x845   :  { %v502_v24 = vpop.permute.xlu1 %501 }
 0x846   :  { %505 = vst.msk [vmem:[#allocation3 + $0x10] sm:$0xff] %vm192_vm5, %v502_v24  ;;  %1350 = vmatmul.mubr.msk.f32.vlgmr.msra.gmra.mrb[4].mxu1 %vm192_vm5, %v502_v24 }
 0x847   :  { %1434 = vmatpush3.bf16.msra.mxu1 %v1590_v8  ;;  %1371 = vmatprep.mubr.msk.f32.mxu1 %vm1525_vm4, %v1526_v7 }
 0x848   :  { %1435 = vmatprep.subr.bf16.mxu1 %v1523_v0 }
 0x84b   :  { %1437 = vmatpush3.bf16.msra.mxu1 %v1606_v12 }
 0x84c   :  { %1444 = vmatprep.subr.bf16.mxu1 %v1523_v0 }
 0x919   :  { %v576_v26 = vpop.f32.mrb[4].mxu1 }
 0x91a   :  { %v580_v27 = vadd.f32 %v576_v26, %v156_v25  ;;  %v1351_v28 = vpop.f32.mrb[5].mxu1  ;;  %v171_v26 = vadd.f32 %v1628_v13, %v1698_v62 }
 0x91c   :  { %1483 = vtanh.f32 %v580_v27  ;;  %v1230_v30 = vmul.f32 -1.442695, %v580_v27 }
 0x91e   :  { %1485 = vpow2.f32 %v1230_v30 }
 0x926   :  { %v1484_v29 = vpop.eup %1483 }
 0x927   :  { %590 = vrot.lane.b32.xlu0 %v1484_v29, %s1527_s17 }
 0x928   :  { %v1486_v31 = vpop.eup %1485 }
 0x929   :  { %v584_v32 = vadd.f32 1.0, %v1486_v31 }
 0x92b   :  { %1487 = vrcp.f32 %v584_v32 }
 0x935   :  { %v1488_v33 = vpop.eup %1487 }
 0x936   :  { %v588_v36 = vmul.f32 %v1488_v33, %v493_v20 }
 0x999   :  { %v591_v34 = vpop.permute.xlu0 %590 }
 0x99a   :  { %v593_v35 = vmul.f32 %v1488_v33, %v591_v34 }
 0x99c   :  { %595 = vrot.lane.b32.xlu1 %v593_v35, %s1528_s2 }
 0xa0e   :  { %v596_v37 = vpop.permute.xlu1 %595 }
 0xa0f   :  { %v598_v38 = vadd.f32 %v596_v37, %v588_v36 }
 0xa11   :  { %1489 = vtanh.f32 %v598_v38 }
 0xa1b   :  { %v1490_v39 = vpop.eup %1489 }
 0xa1c   :  { %601 = vrot.lane.b32.xlu0 %v1490_v39, %s1527_s17 }
 0xa8e   :  { %v602_v40 = vpop.permute.xlu0 %601 }
 0xa8f   :  { %v604_v41 = vmul.f32 %v1488_v33, %v602_v40 }
 0xa91   :  { %606 = vrot.lane.b32.xlu1 %v604_v41, %s1528_s2 }
 0xb03   :  { %v607_v42 = vpop.permute.xlu1 %606 }
 0xb04   :  { %610 = vst.msk [vmem:[#allocation3 + $0x18] sm:$0xff] %vm192_vm5, %v607_v42  ;;  %1361 = vmatmul.mubr.msk.f32.vlgmr.msra.gmra.mrb[10].mxu0 %vm192_vm5, %v607_v42 }
 0xb05   :  { %1440 = vmatpush3.bf16.msra.mxu0 %v1590_v8  ;;  %1382 = vmatprep.mubr.msk.f32.mxu0 %vm1525_vm4, %v1526_v7 }
 0xb06   :  { %1441 = vmatprep.subr.bf16.mxu0 %v1523_v0 }
 0xb09   :  { %1443 = vmatpush3.bf16.msra.mxu0 %v1606_v12 }
 0xbd7   :  { %v681_v44 = vpop.f32.mrb[10].mxu0 }
 0xbd8   :  { %v685_v45 = vadd.f32 %v681_v44, %v161_v43  ;;  %v1362_v46 = vpop.f32.mrb[11].mxu0  ;;  %v176_v43 = vadd.f32 %v1696_v61, %v1628_v13  ;;  %v1769_v13 = vld [vmem:[%s1820_s4] ss:$0 sm:$0xff] }
 0xbda   :  { %1491 = vtanh.f32 %v685_v45  ;;  %v1232_v54 = vmul.f32 -1.442695, %v685_v45 }
 0xbdc   :  { %1493 = vpow2.f32 %v1232_v54 }
 0xbe4   :  { %v1492_v47 = vpop.eup %1491 }
 0xbe5   :  { %695 = vrot.lane.b32.xlu0 %v1492_v47, %s1527_s17 }
 0xbe6   :  { %v1494_v55 = vpop.eup %1493 }
 0xbe7   :  { %v689_v56 = vadd.f32 1.0, %v1494_v55 }
 0xbe9   :  { %1495 = vrcp.f32 %v689_v56 }
 0xbf3   :  { %v1496_v57 = vpop.eup %1495 }
 0xbf4   :  { %v693_v1 = vmul.f32 %v1496_v57, %v598_v38 }
 0xc57   :  { %v696_v58 = vpop.permute.xlu0 %695 }
 0xc58   :  { %v698_v63 = vmul.f32 %v1496_v57, %v696_v58 }
 0xc5a   :  { %700 = vrot.lane.b32.xlu1 %v698_v63, %s1528_s2 }
 0xccc   :  { %v701_v2 = vpop.permute.xlu1 %700 }
 0xccd   :  { %v703_v60 = vadd.f32 %v701_v2, %v693_v1  ;;  %v1032_v1 = vld [vmem:[#allocation3 + $0x8] sm:$0xff] }
 0xcce   :  { %v1047_v61 = vmul.f32 %v1769_v13, %v1032_v1  ;;  %v1159_v1 = vlaneseq }
 0xccf   :  { %1497 = vtanh.f32 %v703_v60 }
 0xcd0   :  { %v1057_v2 = vsel %vm192_vm5, %v1047_v61, 0.0 }
 0xcd9   :  { %v1498_v3 = vpop.eup %1497 }
 0xcda   :  { %706 = vrot.lane.b32.xlu0 %v1498_v3, %s1527_s17 }
 0xd4c   :  { %v707_v4 = vpop.permute.xlu0 %706 }
 0xd4d   :  { %v709_v5 = vmul.f32 %v1496_v57, %v707_v4 }
 0xd4f   :  { %711 = vrot.lane.b32.xlu1 %v709_v5, %s1528_s2 }
 0xdc1   :  { %v712_v9 = vpop.permute.xlu1 %711 }
 0xdc2   :  { %715 = vst.msk [vmem:[#allocation3 + $0x20] sm:$0xff] %vm192_vm5, %v712_v9  ;;  %1372 = vmatmul.mubr.msk.f32.vlgmr.msra.gmra.mrb[6].mxu1 %vm192_vm5, %v712_v9  ;;  %v1031_v9 = vld [vmem:[#allocation3] sm:$0xff] }
 0xdc3   :  { %1446 = vmatpush3.bf16.msra.mxu1 %v1590_v8  ;;  %1393 = vmatprep.mubr.msk.f32.mxu1 %vm1525_vm4, %v1526_v7 }
 0xdc4   :  { %1447 = vmatprep.subr.bf16.mxu1 %v1523_v0 }
 0xdc7   :  { %1449 = vmatpush3.bf16.msra.mxu1 %v1606_v12 }
 0xe95   :  { %v786_v14 = vpop.f32.mrb[6].mxu1 }
 0xe96   :  { %v790_v15 = vadd.f32 %v786_v14, %v166_v10  ;;  %v1373_v16 = vpop.f32.mrb[7].mxu1  ;;  %v1240_v10 = vld [vmem:[%s1821_s5] ss:$0 sm:$0xff]  ;;  %v1046_v14 = vmul.f32 %v1769_v13, %v1031_v9 }
 0xe98   :  { %1499 = vtanh.f32 %v790_v15  ;;  %v1234_v18 = vmul.f32 -1.442695, %v790_v15  ;;  %v1093_v15 = vmul.f32 %v1240_v10, %v1586_v6  ;;  %v1054_v16 = vsel %vm192_vm5, %v1046_v14, 0.0 }
 0xe9a   :  { %1501 = vpow2.f32 %v1234_v18  ;;  %v1094_v18 = vmul.f32 %v1240_v10, %v1604_v11  ;;  %v1098_v11 = vmul.f32 %v1240_v10, %v1670_v51  ;;  %v12_v51 = vstv %s1822_s6 }
 0xe9b   :  { %13 = vst [vmem:[#allocation4] sm:$0x1] %v12_v51 }
 0xea2   :  { %v1500_v17 = vpop.eup %1499 }
 0xea3   :  { %800 = vrot.lane.b32.xlu0 %v1500_v17, %s1527_s17  ;;  %v1101_v17 = vsel %vm45_vm1, %v1093_v15, 0.0 }
 0xea4   :  { %v1502_v8 = vpop.eup %1501 }
 0xea5   :  { %v794_v19 = vadd.f32 1.0, %v1502_v8  ;;  %v1104_v8 = vsel %vm45_vm1, %v1094_v18, 0.0 }
 0xea7   :  { %1503 = vrcp.f32 %v794_v19  ;;  %v1095_v19 = vmul.f32 %v1240_v10, %v1649_v48  ;;  %v1099_v48 = vmul.f32 %v1240_v10, %v1675_v52  ;;  %v1033_v52 = vld [vmem:[#allocation3 + $0x10] sm:$0xff] }
 0xeb1   :  { %v1504_v7 = vpop.eup %1503 }
 0xeb2   :  { %v798_v12 = vmul.f32 %v1504_v7, %v703_v60 }
 0xf15   :  { %v801_v20 = vpop.permute.xlu0 %800 }
 0xf16   :  { %v803_v0 = vmul.f32 %v1504_v7, %v801_v20  ;;  %v1096_v20 = vmul.f32 %v1240_v10, %v1654_v49  ;;  %v1100_v49 = vmul.f32 %v1240_v10, %v1684_v53 }
 0xf18   :  { %805 = vrot.lane.b32.xlu1 %v803_v0, %s1528_s2  ;;  %v1110_v6 = vsel %vm45_vm1, %v1096_v20, 0.0  ;;  %v1097_v0 = vmul.f32 %v1240_v10, %v1659_v50 }
 0xf8a   :  { %v806_v21 = vpop.permute.xlu1 %805 }
 0xf8b   :  { %v808_v59 = vadd.f32 %v806_v21, %v798_v12  ;;  %v1113_v12 = vsel %vm45_vm1, %v1097_v0, 0.0  ;;  %v1116_v21 = vsel %vm45_vm1, %v1098_v11, 0.0 }
 0xf8d   :  { %1505 = vtanh.f32 %v808_v59 }
 0xf97   :  { %v1506_v22 = vpop.eup %1505 }
 0xf98   :  { %811 = vrot.lane.b32.xlu0 %v1506_v22, %s1527_s17 }
0x100a   :  { %v812_v23 = vpop.permute.xlu0 %811 }
0x100b   :  { %v814_v24 = vmul.f32 %v1504_v7, %v812_v23  ;;  %v1107_v7 = vsel %vm45_vm1, %v1095_v19, 0.0  ;;  %v1122_v23 = vsel %vm45_vm1, %v1100_v49, 0.0 }
0x100d   :  { %816 = vrot.lane.b32.xlu1 %v814_v24, %s1528_s2  ;;  %v1529_v24 = vmov 0  }
0x100e   :  { %1457 = vset.pattern.permute.xlu1 %v1529_v24  ;;  %1458 = vset.pattern.permute.xlu0 %v1529_v24 }
0x107f   :  { %v817_v25 = vpop.permute.xlu1 %816 }
0x1080   :  { %820 = vst.msk [vmem:[#allocation3 + $0x28] sm:$0xff] %vm192_vm5, %v817_v25  ;;  %1383 = vmatmul.mubr.msk.f32.vlgmr.msra.gmra.mrb[12].mxu0 %vm192_vm5, %v817_v25  ;;  %v1048_v25 = vmul.f32 %v1769_v13, %v1033_v52 }
0x1082   :  { %v1060_v53 = vsel %vm192_vm5, %v1048_v25, 0.0 }
0x1153   :  { %v891_v27 = vpop.f32.mrb[12].mxu0 }
0x1154   :  { %v895_v28 = vadd.f32 %v891_v27, %v171_v26  ;;  %v1384_v29 = vpop.f32.mrb[13].mxu0  ;;  %v1034_v26 = vld [vmem:[#allocation3 + $0x18] sm:$0xff] }
0x1155   :  { %v1049_v27 = vmul.f32 %v1769_v13, %v1034_v26 }
0x1156   :  { %1507 = vtanh.f32 %v895_v28  ;;  %v1236_v31 = vmul.f32 -1.442695, %v895_v28  ;;  %v1035_v28 = vld [vmem:[#allocation3 + $0x20] sm:$0xff] }
0x1157   :  { %v1063_v29 = vsel %vm192_vm5, %v1049_v27, 0.0 }
0x1158   :  { %1509 = vpow2.f32 %v1236_v31  ;;  %v1036_v31 = vld [vmem:[#allocation3 + $0x28] sm:$0xff] }
0x1160   :  { %v1508_v30 = vpop.eup %1507 }
0x1161   :  { %905 = vrot.lane.b32.xlu0 %v1508_v30, %s1527_s17  ;;  %v1050_v30 = vmul.f32 %v1769_v13, %v1035_v28 }
0x1162   :  { %v1510_v32 = vpop.eup %1509 }
0x1163   :  { %v899_v33 = vadd.f32 1.0, %v1510_v32  ;;  %v1066_v32 = vsel %vm192_vm5, %v1050_v30, 0.0 }
0x1165   :  { %1511 = vrcp.f32 %v899_v33  ;;  %v1051_v33 = vmul.f32 %v1769_v13, %v1036_v31 }
0x116f   :  { %v1512_v34 = vpop.eup %1511 }
0x1170   :  { %v903_v37 = vmul.f32 %v1512_v34, %v808_v59  ;;  %v1119_v59 = vsel %vm45_vm1, %v1099_v48, 0.0 }
0x11d3   :  { %v906_v35 = vpop.permute.xlu0 %905 }
0x11d4   :  { %v908_v36 = vmul.f32 %v1512_v34, %v906_v35  ;;  %v1069_v35 = vsel %vm192_vm5, %v1051_v33, 0.0 }
0x11d6   :  { %910 = vrot.lane.b32.xlu1 %v908_v36, %s1528_s2 }
0x1248   :  { %v911_v38 = vpop.permute.xlu1 %910 }
0x1249   :  { %v913_v62 = vadd.f32 %v911_v38, %v903_v37 }
0x124b   :  { %1513 = vtanh.f32 %v913_v62 }
0x1255   :  { %v1514_v39 = vpop.eup %1513 }
0x1256   :  { %916 = vrot.lane.b32.xlu0 %v1514_v39, %s1527_s17 }
0x12c8   :  { %v917_v40 = vpop.permute.xlu0 %916 }
0x12c9   :  { %v919_v41 = vmul.f32 %v1512_v34, %v917_v40 }
0x12cb   :  { %921 = vrot.lane.b32.xlu1 %v919_v41, %s1528_s2 }
0x133d   :  { %v922_v42 = vpop.permute.xlu1 %921 }
0x133e   :  { %925 = vst.msk [vmem:[#allocation3 + $0x30] sm:$0xff] %vm192_vm5, %v922_v42  ;;  %1394 = vmatmul.mubr.msk.f32.vlgmr.msra.gmra.mrb[8].mxu1 %vm192_vm5, %v922_v42  ;;  %v1241_v42 = vld [vmem:[#allocation4] ss:$0 sm:$0xff] }
0x1345   :  { %v1037_v34 = vld [vmem:[#allocation3 + $0x30] sm:$0xff] }
0x1346   :  { %v1052_v36 = vmul.f32 %v1769_v13, %v1037_v34 }
0x1348   :  { %v1072_v37 = vsel %vm192_vm5, %v1052_v36, 0.0 }
0x1411   :  { %v996_v44 = vpop.f32.mrb[8].mxu1 }
0x1412   :  { %v1000_v45 = vadd.f32 %v996_v44, %v176_v43  ;;  %v1395_v46 = vpop.f32.mrb[9].mxu1 }
0x1414   :  { %1515 = vtanh.f32 %v1000_v45  ;;  %v1238_v54 = vmul.f32 -1.442695, %v1000_v45 }
0x1416   :  { %1517 = vpow2.f32 %v1238_v54 }
0x141e   :  { %v1516_v47 = vpop.eup %1515 }
0x141f   :  { %1010 = vrot.lane.b32.xlu0 %v1516_v47, %s1527_s17 }
0x1420   :  { %v1518_v55 = vpop.eup %1517 }
0x1421   :  { %v1004_v56 = vadd.f32 1.0, %v1518_v55 }
0x1423   :  { %1519 = vrcp.f32 %v1004_v56 }
0x142d   :  { %v1520_v57 = vpop.eup %1519 }
0x142e   :  { %v1008_v60 = vmul.f32 %v1520_v57, %v913_v62 }
0x1491   :  { %v1011_v58 = vpop.permute.xlu0 %1010 }
0x1492   :  { %v1013_v63 = vmul.f32 %v1520_v57, %v1011_v58 }
0x1494   :  { %1015 = vrot.lane.b32.xlu1 %v1013_v63, %s1528_s2 }
0x14b8   :  { %1058 = vadd.xlane.f32.xlu1 %v1057_v2 }
0x1506   :  { %v1016_v3 = vpop.permute.xlu1 %1015 }
0x1507   :  { %v1018_v4 = vadd.f32 %v1016_v3, %v1008_v60  ;;  %v1162_v60 = vshrl.u32 %v1159_v1, 7 }
0x1509   :  { %1521 = vtanh.f32 %v1018_v4 }
0x1513   :  { %v1522_v5 = vpop.eup %1521 }
0x1514   :  { %1021 = vrot.lane.b32.xlu0 %v1522_v5, %s1527_s17 }
0x1533   :  { %1055 = vadd.xlane.f32.xlu0 %v1054_v16 }
0x1537   :  { %1102 = vadd.xlane.f32.xlu0 %v1101_v17 }
0x153b   :  { %1105 = vadd.xlane.f32.xlu0 %v1104_v8 }
0x153f   :  { %1108 = vadd.xlane.f32.xlu0 %v1107_v7 }
0x1543   :  { %1111 = vadd.xlane.f32.xlu0 %v1110_v6 }
0x1545   :  { %v1059_v38 = vpop.xlane.xlu1 %1058 }
0x1547   :  { %1114 = vadd.xlane.f32.xlu0 %v1113_v12 }
0x154b   :  { %1117 = vadd.xlane.f32.xlu0 %v1116_v21 }
0x154f   :  { %1120 = vadd.xlane.f32.xlu0 %v1119_v59 }
0x1553   :  { %1123 = vadd.xlane.f32.xlu0 %v1122_v23 }
0x1586   :  { %v1022_v22 = vpop.permute.xlu0 %1021 }
0x1587   :  { %v1024_v50 = vmul.f32 %v1520_v57, %v1022_v22 }
0x1589   :  { %1026 = vrot.lane.b32.xlu1 %v1024_v50, %s1528_s2 }
0x15ad   :  { %1061 = vadd.xlane.f32.xlu1 %v1060_v53 }
0x15b1   :  { %1064 = vadd.xlane.f32.xlu1 %v1063_v29 }
0x15b5   :  { %1067 = vadd.xlane.f32.xlu1 %v1066_v32 }
0x15b9   :  { %1070 = vadd.xlane.f32.xlu1 %v1069_v35 }
0x15bd   :  { %1073 = vadd.xlane.f32.xlu1 %v1072_v37 }
0x15c0   :  { %v1056_v43 = vpop.xlane.xlu0 %1055 }
0x15c4   :  { %v1103_v44 = vpop.xlane.xlu0 %1102 }
0x15c5   :  { %v1125_v4 = vadd.f32 %v1103_v44, %v1056_v43 }
0x15c8   :  { %v1106_v45 = vpop.xlane.xlu0 %1105 }
0x15c9   :  { %v1126_v5 = vadd.f32 %v1106_v45, %v1059_v38 }
0x15cc   :  { %v1109_v47 = vpop.xlane.xlu0 %1108 }
0x15d0   :  { %v1112_v55 = vpop.xlane.xlu0 %1111 }
0x15d4   :  { %v1115_v57 = vpop.xlane.xlu0 %1114 }
0x15d8   :  { %v1118_v63 = vpop.xlane.xlu0 %1117 }
0x15dc   :  { %v1121_v2 = vpop.xlane.xlu0 %1120 }
0x15e0   :  { %v1124_v14 = vpop.xlane.xlu0 %1123 }
0x15fb   :  { %v1027_v62 = vpop.permute.xlu1 %1026 }
0x15fc   :  { %1030 = vst.msk [vmem:[#allocation3 + $0x38] sm:$0xff] %vm192_vm5, %v1027_v62 }
0x1603   :  { %v1038_v39 = vld [vmem:[#allocation3 + $0x38] sm:$0xff] }
0x1604   :  { %v1053_v40 = vmul.f32 %v1769_v13, %v1038_v39  ;;  %v1160_v13 = vand.u32 127, %v1159_v1 }
0x1606   :  { %v1075_v41 = vsel %vm192_vm5, %v1053_v40, 0.0  ;;  %v1163_v15 = vsub.s32 %v1160_v13, %v1162_v60 }
0x1607   :  { %1076 = vadd.xlane.f32.xlu1 %v1075_v41 }
0x1618   :  { %1140 = vperm.xlu1 %1457, %v1241_v42  }
0x163a   :  { %v1062_v46 = vpop.xlane.xlu1 %1061 }
0x163b   :  { %v1127_v9 = vadd.f32 %v1109_v47, %v1062_v46 }
0x163e   :  { %v1065_v54 = vpop.xlane.xlu1 %1064 }
0x163f   :  { %v1128_v10 = vadd.f32 %v1112_v55, %v1065_v54 }
0x1642   :  { %v1068_v56 = vpop.xlane.xlu1 %1067 }
0x1643   :  { %v1129_v16 = vadd.f32 %v1115_v57, %v1068_v56 }
0x1646   :  { %v1071_v58 = vpop.xlane.xlu1 %1070 }
0x1647   :  { %v1130_v17 = vadd.f32 %v1118_v63, %v1071_v58 }
0x164a   :  { %v1074_v61 = vpop.xlane.xlu1 %1073 }
0x164b   :  { %v1131_v6 = vadd.f32 %v1121_v2, %v1074_v61 }
0x1694   :  { %v1077_v3 = vpop.xlane.xlu1 %1076 }
0x1695   :  { %v1132_v0 = vadd.f32 %v1124_v14, %v1077_v3 }
0x1698   :  { %v1141_v18 = vpop.permute.xlu1 %1140 }
0x1699   :  { %v1143_v8 = vadd.f32 %v1141_v18, %v1125_v4  ;;  %v1144_v19 = vadd.f32 %v1141_v18, %v1126_v5  ;;  %v1145_v7 = vadd.f32 %v1141_v18, %v1127_v9  ;;  %v1146_v20 = vadd.f32 %v1141_v18, %v1128_v10 }
0x169a   :  { %v1147_v12 = vadd.f32 %v1141_v18, %v1129_v16  ;;  %v1148_v11 = vadd.f32 %v1141_v18, %v1130_v17  ;;  %v1149_v49 = vadd.f32 %v1141_v18, %v1131_v6  ;;  %v1150_v22 = vadd.f32 %v1141_v18, %v1132_v0 }
0x169b   :  { %v1164_v21 = vrot.slane %v1143_v8, %v1163_v15  ;;  %v1168_v48 = vrot.slane %v1144_v19, %v1163_v15  ;;  %v1172_v59 = vrot.slane %v1145_v7, %v1163_v15  ;;  %v1176_v23 = vrot.slane %v1146_v20, %v1163_v15 }
0x169c   :  { %v1180_v24 = vrot.slane %v1147_v12, %v1163_v15  ;;  %v1184_v52 = vrot.slane %v1148_v11, %v1163_v15  ;;  %v1188_v26 = vrot.slane %v1149_v49, %v1163_v15  ;;  %v1192_v27 = vrot.slane %v1150_v22, %v1163_v15 }
0x169d   :  { %v1194_v50 = vsel %vm1193_vm6, %v1168_v48, %v1164_v21 }
0x169e   :  { %v1196_v51 = vsel %vm1195_vm7, %v1172_v59, %v1194_v50 }
0x169f   :  { %v1198_v25 = vsel %vm1197_vm8, %v1176_v23, %v1196_v51 }
0x16a0   :  { %v1200_v53 = vsel %vm1199_vm9, %v1180_v24, %v1198_v25 }
0x16a1   :  { %v1202_v28 = vsel %vm1201_vm10, %v1184_v52, %v1200_v53 }
0x16a2   :  { %v1204_v29 = vsel %vm1203_vm11, %v1188_v26, %v1202_v28 }
0x16a3   :  { %v1206_v30 = vsel %vm1205_vm12, %v1192_v27, %v1204_v29 }
0x16a4   :  { %1209 = vst.msk [vmem:[%s1823_s7] sm:$0xff] %vm1208_vm13, %v1206_v30 }

</bundles_post_ra>
